<compile_context>
chip_gen: v7x
topology: tpu7x:2x2x1
jax: 0.10.0
libtpu: 0.0.40
codegen_flags: <defaults>
</compile_context>

<pallas_src>
import functools

import jax
import jax.numpy as jnp
from jax.experimental import pallas as pl
from jax.experimental.pallas import tpu as pltpu


def _round_up(x, m):
    return ((x + m - 1) // m) * m


# --------------------------------------------------------------------------
# Kernels
# --------------------------------------------------------------------------
def linear_stats_kernel(x_ref, w_ref, h_ref, stats_ref):
    """h = x @ w (bf16 operands, f32 accumulate) + per-tile (sum, sum_sq) of h."""
    h = jnp.dot(x_ref[...], w_ref[...], preferred_element_type=jnp.float32)
    h_ref[...] = h.astype(h_ref.dtype)
    s = jnp.sum(h, axis=0, keepdims=True)           # (1, F)
    ss = jnp.sum(h * h, axis=0, keepdims=True)      # (1, F)
    stats_ref[...] = jnp.concatenate([s, ss], axis=0).reshape(1, 2, -1)


def bn_relu_linear_stats_kernel(h_ref, scale_ref, shift_ref, w_ref,
                                o_ref, stats_ref, *, true_batch, tile_b):
    """a = relu(h*scale + shift); o = a @ w; emit per-tile (sum, sum_sq) of o."""
    a = jnp.maximum(h_ref[...].astype(jnp.float32) * scale_ref[...]
                    + shift_ref[...], 0.0)
    if true_batch % tile_b != 0:
        # Zero padded batch rows so they contribute nothing to the next BN stats.
        row = (pl.program_id(0) * tile_b
               + jax.lax.broadcasted_iota(jnp.int32, (tile_b, 1), 0))
        a = jnp.where(row < true_batch, a, 0.0)
    o = jnp.dot(a.astype(w_ref.dtype), w_ref[...],
                preferred_element_type=jnp.float32)
    o_ref[...] = o.astype(o_ref.dtype)
    s = jnp.sum(o, axis=0, keepdims=True)
    ss = jnp.sum(o * o, axis=0, keepdims=True)
    stats_ref[...] = jnp.concatenate([s, ss], axis=0).reshape(1, 2, -1)


def bn_relu_linear_bias_kernel(h_ref, scale_ref, shift_ref, w_ref, b_ref, o_ref):
    """out = relu(h*scale + shift) @ w + b (lane-dense padded output)."""
    a = jnp.maximum(h_ref[...].astype(jnp.float32) * scale_ref[...]
                    + shift_ref[...], 0.0)
    out = jnp.dot(a.astype(w_ref.dtype), w_ref[...],
                  preferred_element_type=jnp.float32) + b_ref[...]
    o_ref[...] = out.astype(o_ref.dtype)


# --------------------------------------------------------------------------
# Wrapper
# --------------------------------------------------------------------------
def _bn_scale_shift(stats, batch, gamma, beta, eps):
    """Fold per-tile (sum, sum_sq) into per-feature affine scale/shift (f32)."""
    s = jnp.sum(stats, axis=0)                        # (2, F)
    mu = s[0] / batch
    var = jnp.maximum(s[1] / batch - mu * mu, 0.0)    # biased variance, one pass
    inv = jax.lax.rsqrt(var + eps)
    scale = gamma * inv
    shift = beta - mu * scale
    return (scale.reshape(1, -1).astype(jnp.float32),
            shift.reshape(1, -1).astype(jnp.float32))


def feedforward_net(x, params, *, batch_tile=256, eps=1e-5):
    """x: [B, input_dim] float32. params: see init_params. Returns [B, out_dim] f32."""
    B, K = x.shape
    H1 = params["w1"].shape[1]            # 512
    H2 = params["w2"].shape[1]            # 256
    out_dim = params["w3"].shape[1]
    OUT_PAD = _round_up(out_dim, 128)     # lane-dense output store

    # Batch tile: multiple of 8 sublanes; 256 rows keeps the per-step footprint
    # (bf16 tiles + weights, double-buffered) well under the scoped VMEM limit
    # on all of v5e/v6e/v7x. Raise batch_tile for more DMA efficiency.
    TB = min(batch_tile, _round_up(B, 8))
    B_pad = _round_up(B, TB)
    n_tiles = B_pad // TB

    # bf16 matmul operands (f32 accumulation inside the kernels).
    xb = jnp.zeros((B_pad, K), jnp.bfloat16).at[:B].set(x.astype(jnp.bfloat16))
    w1 = params["w1"].astype(jnp.bfloat16)
    w2 = params["w2"].astype(jnp.bfloat16)
    w3 = jnp.zeros((H2, OUT_PAD), jnp.bfloat16).at[:, :out_dim].set(
        params["w3"].astype(jnp.bfloat16))
    b3 = jnp.zeros((1, OUT_PAD), jnp.float32).at[:, :out_dim].set(
        params["b3"].reshape(1, -1).astype(jnp.float32))
    # Note: b1/b2 intentionally unused here — a Linear bias immediately followed
    # by BatchNorm cancels exactly in the batch-mean subtraction.

    cparams = pltpu.CompilerParams(
        dimension_semantics=("parallel",),     # shard batch tiles across cores
        vmem_limit_bytes=32 * 1024 * 1024,
    )

    # ---- Stage 1: h1 = x @ w1  (+ per-tile stats of h1) -------------------
    # K is small; if input_dim were large, add a k-axis grid + f32 accumulator
    # instead of loading all of w1 as one block.
    h1, stats1 = pl.pallas_call(
        linear_stats_kernel,
        grid=(n_tiles,),
        in_specs=[pl.BlockSpec((TB, K), lambda i: (i, 0)),
                  pl.BlockSpec((K, H1), lambda i: (0, 0))],
        out_specs=(pl.BlockSpec((TB, H1), lambda i: (i, 0)),
                   pl.BlockSpec((1, 2, H1), lambda i: (i, 0, 0))),
        out_shape=(jax.ShapeDtypeStruct((B_pad, H1), jnp.bfloat16),
                   jax.ShapeDtypeStruct((n_tiles, 2, H1), jnp.float32)),
        compiler_params=cparams,
    )(xb, w1)
    scale1, shift1 = _bn_scale_shift(stats1, B, params["g1"], params["be1"], eps)

    # ---- Stage 2: h2 = relu(bn(h1)) @ w2  (+ per-tile stats of h2) --------
    k2 = functools.partial(bn_relu_linear_stats_kernel, true_batch=B, tile_b=TB)
    h2, stats2 = pl.pallas_call(
        k2,
        grid=(n_tiles,),
        in_specs=[pl.BlockSpec((TB, H1), lambda i: (i, 0)),
                  pl.BlockSpec((1, H1), lambda i: (0, 0)),
                  pl.BlockSpec((1, H1), lambda i: (0, 0)),
                  pl.BlockSpec((H1, H2), lambda i: (0, 0))],
        out_specs=(pl.BlockSpec((TB, H2), lambda i: (i, 0)),
                   pl.BlockSpec((1, 2, H2), lambda i: (i, 0, 0))),
        out_shape=(jax.ShapeDtypeStruct((B_pad, H2), jnp.bfloat16),
                   jax.ShapeDtypeStruct((n_tiles, 2, H2), jnp.float32)),
        compiler_params=cparams,
    )(h1, scale1, shift1, w2)
    scale2, shift2 = _bn_scale_shift(stats2, B, params["g2"], params["be2"], eps)

    # ---- Stage 3: out = relu(bn(h2)) @ w3 + b3 (lane-dense padded) --------
    out = pl.pallas_call(
        bn_relu_linear_bias_kernel,
        grid=(n_tiles,),
        in_specs=[pl.BlockSpec((TB, H2), lambda i: (i, 0)),
                  pl.BlockSpec((1, H2), lambda i: (0, 0)),
                  pl.BlockSpec((1, H2), lambda i: (0, 0)),
                  pl.BlockSpec((H2, OUT_PAD), lambda i: (0, 0)),
                  pl.BlockSpec((1, OUT_PAD), lambda i: (0, 0))],
        out_specs=pl.BlockSpec((TB, OUT_PAD), lambda i: (i, 0)),
        out_shape=jax.ShapeDtypeStruct((B_pad, OUT_PAD), jnp.float32),
        compiler_params=cparams,
    )(h2, scale2, shift2, w3, b3)

    return out[:B, :out_dim]


# --------------------------------------------------------------------------
# Params / reference / test
# --------------------------------------------------------------------------
def init_params(key, input_dim, output_dim):
    """PyTorch-style init (f32 master copies): Linear W,b ~ U(-1/sqrt(fan_in), +),
    BatchNorm gamma=1, beta=0. Weights stored as [in, out]."""
    ks = jax.random.split(key, 6)

    def linear(kw, kb, fan_in, fan_out):
        bound = 1.0 / float(fan_in) ** 0.5
        w = jax.random.uniform(kw, (fan_in, fan_out), jnp.float32, -bound, bound)
        b = jax.random.uniform(kb, (fan_out,), jnp.float32, -bound, bound)
        return w, b

    w1, b1 = linear(ks[0], ks[1], input_dim, 512)
    w2, b2 = linear(ks[2], ks[3], 512, 256)
    w3, b3 = linear(ks[4], ks[5], 256, output_dim)
    return {
        "w1": w1, "b1": b1,
        "g1": jnp.ones((512,), jnp.float32), "be1": jnp.zeros((512,), jnp.float32),
        "w2": w2, "b2": b2,
        "g2": jnp.ones((256,), jnp.float32), "be2": jnp.zeros((256,), jnp.float32),
        "w3": w3, "b3": b3,
    }


def _reference(x, p, eps=1e-5):
    """Pure-JAX f32 reference with PyTorch training-mode semantics (biases b1/b2
    kept here — they cancel under BatchNorm, which the kernel exploits)."""
    def bn_relu(h, g, b):
        mu = h.mean(0, keepdims=True)
        var = ((h - mu) ** 2).mean(0, keepdims=True)
        return jnp.maximum((h - mu) * jax.lax.rsqrt(var + eps) * g + b, 0.0)

    h = bn_relu(x @ p["w1"] + p["b1"], p["g1"], p["be1"])
    h = bn_relu(h @ p["w2"] + p["b2"], p["g2"], p["be2"])
    return h @ p["w3"] + p["b3"]


if __name__ == "__main__":
    B, INPUT_DIM, OUTPUT_DIM = 8, 32, 16

    key = jax.random.PRNGKey(0)
    k_x, k_p = jax.random.split(key)
    x = jax.random.normal(k_x, (B, INPUT_DIM), jnp.float32)
    params = init_params(k_p, INPUT_DIM, OUTPUT_DIM)

    out = feedforward_net(x, params)
    out = jax.block_until_ready(out)

    ref = _reference(x, params)
    assert out.shape == (B, OUTPUT_DIM), out.shape
    # bf16 matmul operands vs f32 reference -> loosened tolerance.
    assert jnp.allclose(out, ref, atol=8e-2, rtol=8e-2), float(jnp.abs(out - ref).max())

    print("KERNEL_OK")
</pallas_src>

<mosaic_0001>
module attributes {stable_mosaic.version = 11 : i64} {
  func.func @linear_stats_kernel(%arg0: i32, %arg1: memref<8x32xbf16, #tpu.memory_space<vmem>>, %arg2: memref<32x512xbf16, #tpu.memory_space<vmem>>, %arg3: memref<8x512xbf16, #tpu.memory_space<vmem>>, %arg4: memref<1x2x512xf32, #tpu.memory_space<vmem>>) attributes {dimension_semantics = [#tpu.dimension_semantics<parallel>], iteration_bounds = array<i64: 1>, scalar_prefetch = 0 : i64, scratch_operands = 0 : i64, tpu.core_type = #tpu.core_type<tc>, window_params = [{transform_indices = @transform_0, window_bounds = array<i64: 8, 32>}, {pipeline_mode = #tpu.pipeline_mode<synchronous>, transform_indices = @transform_1, window_bounds = array<i64: 32, 512>}, {transform_indices = @transform_2, window_bounds = array<i64: 8, 512>}, {transform_indices = @transform_3, window_bounds = array<i64: 1, 2, 512>}]} {
    %c0 = arith.constant 0 : index
    %c0_0 = arith.constant 0 : index
    %0 = vector.load %arg1[%c0, %c0_0] : memref<8x32xbf16, #tpu.memory_space<vmem>>, vector<8x32xbf16>
    %c0_1 = arith.constant 0 : index
    %c0_2 = arith.constant 0 : index
    %1 = vector.load %arg2[%c0_1, %c0_2] : memref<32x512xbf16, #tpu.memory_space<vmem>>, vector<32x512xbf16>
    %cst = arith.constant dense<0.000000e+00> : vector<8x512xf32>
    %2 = tpu.matmul %0, %1, %cst {dimension_numbers = #tpu.dot_dimension_numbers<[1], [0], [0], [1], [0, 0, 1, 1], [], []>} : vector<8x32xbf16>, vector<32x512xbf16>, vector<8x512xf32> -> vector<8x512xf32>
    %3 = arith.truncf %2 : vector<8x512xf32> to vector<8x512xbf16>
    %c0_3 = arith.constant 0 : index
    %c0_4 = arith.constant 0 : index
    %4 = vector.load %arg3[%c0_3, %c0_4] : memref<8x512xbf16, #tpu.memory_space<vmem>>, vector<8x512xbf16>
    tpu.vector_store %arg3[%c0_3, %c0_4], %3 {strides = array<i32>} : memref<8x512xbf16, #tpu.memory_space<vmem>>, vector<8x512xbf16>,
    %cst_5 = arith.constant dense<0.000000e+00> : vector<512xf32>
    %5 = vector.multi_reduction <add>, %2, %cst_5 [0] : vector<8x512xf32> to vector<512xf32>
    %6 = vector.shape_cast %5 : vector<512xf32> to vector<1x512xf32>
    %7 = arith.mulf %2, %2 : vector<8x512xf32>
    %cst_6 = arith.constant dense<0.000000e+00> : vector<512xf32>
    %8 = vector.multi_reduction <add>, %7, %cst_6 [0] : vector<8x512xf32> to vector<512xf32>
    %9 = vector.shape_cast %8 : vector<512xf32> to vector<1x512xf32>
    %10 = tpu.concatenate %6, %9 in 0 : vector<1x512xf32>, vector<1x512xf32> -> vector<2x512xf32>
    %11 = vector.shape_cast %10 : vector<2x512xf32> to vector<1x2x512xf32>
    %c0_7 = arith.constant 0 : index
    %c0_8 = arith.constant 0 : index
    %c0_9 = arith.constant 0 : index
    %12 = vector.load %arg4[%c0_7, %c0_8, %c0_9] : memref<1x2x512xf32, #tpu.memory_space<vmem>>, vector<1x2x512xf32>
    tpu.vector_store %arg4[%c0_7, %c0_8, %c0_9], %11 {strides = array<i32>} : memref<1x2x512xf32, #tpu.memory_space<vmem>>, vector<1x2x512xf32>,
    return
  }
  func.func @transform_0(%arg0: i32) -> (i32, i32) {
    %c0_i32 = arith.constant 0 : i32
    %c0_i32_0 = arith.constant 0 : i32
    return %arg0, %c0_i32 : i32, i32
  }
  func.func @transform_1(%arg0: i32) -> (i32, i32) {
    %c0_i32 = arith.constant 0 : i32
    %c0_i32_0 = arith.constant 0 : i32
    %c0_i32_1 = arith.constant 0 : i32
    return %c0_i32, %c0_i32_0 : i32, i32
  }
  func.func @transform_2(%arg0: i32) -> (i32, i32) {
    %c0_i32 = arith.constant 0 : i32
    %c0_i32_0 = arith.constant 0 : i32
    return %arg0, %c0_i32 : i32, i32
  }
  func.func @transform_3(%arg0: i32) -> (i32, i32, i32) {
    %c0_i32 = arith.constant 0 : i32
    %c0_i32_0 = arith.constant 0 : i32
    %c0_i32_1 = arith.constant 0 : i32
    return %arg0, %c0_i32, %c0_i32_0 : i32, i32, i32
  }
}

</mosaic_0001>

<bundles_post_ra>
// kernel: tpu_custom_call.1
= control target key start
LH: loop header
LB: loop body
LE: loop exit
PB: predicated region body
PF: predicated region fallthrough
CT: control target
= control target key end

     0   :  { %9 = vsyncpa [#allocation3], 0  ;;  %s539_s0 = inlined_call_operand.hbm [shape: bf16[8,32], index: 0, kind: input, shape index: {}]   ;;  %s540_s1 = inlined_call_operand.hbm [shape: bf16[32,512], index: 1, kind: input, shape index: {}]   ;;  %s541_s2 = inlined_call_operand.hbm [shape: bf16[8,512], index: 2, kind: output, shape index: {0}]   ;;  %s542_s3 = inlined_call_operand.hbm [shape: f32[1,2,512], index: 3, kind: output, shape index: {1}]  }
   0x1   :  { %10 = vsyncpa [#allocation6], 0 }
   0x2   :  { %11 = vsyncpa [#allocation4], 0 }
   0x3   :  { %12 = vsyncpa [#allocation9], 0  ;;  %s435_s12 = smov [#allocation2]   ;;  %s436_s14 = smov [#allocation5]  }
   0x4   :  { %s19_s13 = sshll.u32 %s435_s12, 4  ;;  %s28_s15 = sshll.u32 %s436_s14, 4  ;;  %s20_s13 = int_to_ptr.vmem [resolvable:$true] %s19_s13  ;;  %s463_s15 = int_to_ptr.vmem [resolvable:$true] %s28_s15 }
   0x5   :  { %s339_s18 = scalar_lea.hbm %s539_s0, 64 }
   0x6   :  { %p340_p0 = scmp.ne.s32.totalorder %s539_s0, %s339_s18  ;;  %p343_p1 = scmp.lt.u32.totalorder %s339_s18, %s539_s0 }
   0x8   :  { %p345_p2 = pnand %p343_p1, %p340_p0 }
   0xa   :  { %348 = shalt.err (!%p345_p2)
}
   0xb   :  { %s349_s23 = scalar_lea.vmem %s20_s13, 64  ;;  %p354_p4 = scmp.lt.s32.totalorder %s20_s13, %s20_s13 }
   0xc   :  { %p350_p3 = scmp.ne.s32.totalorder %s20_s13, %s349_s23  ;;  %p355_p5 = scmp.lt.s32.totalorder %s349_s23, %s349_s23 }
   0xe   :  { %p356_p6 = por %p355_p5, %p354_p4 }
  0x10   :  { %p357_p7 = pnand %p356_p6, %p350_p3 }
  0x12   :  { %360 = shalt.err (!%p357_p7)
}
  0x13   :  { %22 = dma.hbm_to_vmem [thread:$0]  %s539_s0, 64, %s20_s13, [#allocation3]  }
  0x14   :  { %s361_s28 = scalar_lea.hbm %s540_s1, 1024 }
  0x15   :  { %p362_p8 = scmp.ne.s32.totalorder %s540_s1, %s361_s28  ;;  %p365_p9 = scmp.lt.u32.totalorder %s361_s28, %s540_s1 }
  0x17   :  { %p367_p10 = pnand %p365_p9, %p362_p8 }
  0x19   :  { %370 = shalt.err (!%p367_p10)
}
  0x1a   :  { %s371_s6 = scalar_lea.vmem %s463_s15, 1024  ;;  %p376_p12 = scmp.lt.s32.totalorder %s463_s15, %s463_s15 }
  0x1b   :  { %p372_p11 = scmp.ne.s32.totalorder %s463_s15, %s371_s6  ;;  %p377_p13 = scmp.lt.s32.totalorder %s371_s6, %s371_s6 }
  0x1d   :  { %p378_p0 = por %p377_p13, %p376_p12 }
  0x1f   :  { %p379_p1 = pnand %p378_p0, %p372_p11 }
  0x21   :  { %382 = shalt.err (!%p379_p1)
}
  0x22   :  { %s437_s0 = smov 256   ;;  %s438_s7 = smov 16  }
  0x23   :  { %34 = dma.hbm_to_vmem [thread:$0]  %s540_s1, 1024, %s463_s15, [#allocation6], %s437_s0, %s437_s0, %s438_s7  }
  0x24   :  { %427 = dma.done.wait [#allocation3], 64  }
  0x25   :  { %428 = vsyncadd [#allocation3], 4294967232 }
  0x26   :  { %429 = dma.done.wait [#allocation6], 1024  }
  0x27   :  { %430 = vsyncadd [#allocation6], 4294966272  ;;  %v439_v0 = vmov 0   ;;  %v327_v1 = vld [vmem:[#allocation5 + $0x4] ss:$16 sps:$4 sm:$0xff]   ;;  %vm91_vm0 = vcmask 261120   ;;  %v261_v14 = vlaneseq }
  0x28   :  { %127 = vmatprep.mubr.bf16.mxu0 %v439_v0  ;;  %168 = vmatprep.mubr.bf16.mxu1 %v439_v0  ;;  %v329_v2 = vld [vmem:[#allocation5 + $0xc] ss:$16 sps:$4 sm:$0xff]   ;;  %v331_v3 = vld [vmem:[#allocation5] ss:$16 sps:$4 sm:$0xff]   ;;  %v332_v4 = vld [vmem:[#allocation5 + $0x8] ss:$16 sps:$4 sm:$0xff]  }
  0x29   :  { %95 = vmatprep.subr.bf16.mxu0 %v327_v1  ;;  %136 = vmatprep.subr.bf16.mxu1 %v329_v2  ;;  %v333_v5 = vld [vmem:[#allocation5 + $0x24] ss:$16 sps:$4 sm:$0xff]   ;;  %v335_v6 = vld [vmem:[#allocation5 + $0x2c] ss:$16 sps:$4 sm:$0xff]   ;;  %v337_v7 = vld [vmem:[#allocation5 + $0x20] ss:$16 sps:$4 sm:$0xff]  }
  0x2a   :  { %96 = vmatpush1.bf16.msra.mxu0 %v331_v3  ;;  %137 = vmatpush1.bf16.msra.mxu1 %v332_v4  ;;  %v338_v8 = vld [vmem:[#allocation5 + $0x28] ss:$16 sps:$4 sm:$0xff]   ;;  %v42_v9 = vld [vmem:[#allocation2] sm:$0xf]  ;;  %v440_v12 = vmov 1983009808  }
  0x2b   :  { %97 = vmatprep.subr.bf16.mxu0 %v333_v5  ;;  %138 = vmatprep.subr.bf16.mxu1 %v335_v6  ;;  %v498_v13 = vunpack.c.l.s4 %v440_v12  ;;  %vm247_vm1 = vcmask 1040384   ;;  %s441_s1 = smov [#allocation7]   ;;  %v262_v0 = vshrl.u32 %v261_v14, 7 }
  0x2c   :  { %s281_s10 = sshll.u32 %s441_s1, 4  ;;  %s282_s10 = int_to_ptr.vmem [resolvable:$true] %s281_s10 }
  0x2d   :  { %v260_v63 = vunpack.c.0.s8 %v498_v13  ;;  %s383_s11 = scalar_lea.vmem %s282_s10, 256  ;;  %p388_p3 = scmp.lt.s32.totalorder %s282_s10, %s282_s10 }
  0x2e   :  { %98 = vmatpush1.bf16.msra.mxu0 %v337_v7  ;;  %139 = vmatpush1.bf16.msra.mxu1 %v338_v8  ;;  %p384_p2 = scmp.ne.s32.totalorder %s282_s10, %s383_s11  ;;  %p389_p4 = scmp.lt.s32.totalorder %s383_s11, %s383_s11 }
  0x30   :  { %p390_p5 = por %p389_p4, %p388_p3 }
  0x31   :  { %313 = vmatmul.mubr.msk.bf16.vlgmr.msra.gmra.mrb[0].mxu0 %vm91_vm0, %v42_v9  ;;  %314 = vmatmul.mubr.msk.bf16.vlgmr.msra.gmra.mrb[0].mxu1 %vm91_vm0, %v42_v9 }
  0x32   :  { %p391_p6 = pnand %p390_p5, %p384_p2 }
 0x104   :  { %v494_v10 = vpop.f32.mrb[0].mxu0  ;;  %v496_v11 = vpop.f32.mrb[0].mxu1 }
 0x105   :  { %v195_v15 = vrot.slane %v494_v10, 4  ;;  %v219_v16 = vmul.f32 %v494_v10, %v494_v10  ;;  %v207_v17 = vrot.slane %v496_v11, 4  ;;  %v221_v18 = vmul.f32 %v496_v11, %v496_v11  ;;  %v131_v19 = vpop.f32.mrb[1].mxu0  ;;  %v172_v20 = vpop.f32.mrb[1].mxu1 }
 0x106   :  { %v201_v21 = vrot.slane %v131_v19, 4  ;;  %v220_v22 = vmul.f32 %v131_v19, %v131_v19  ;;  %v213_v23 = vrot.slane %v172_v20, 4  ;;  %v222_v24 = vmul.f32 %v172_v20, %v172_v20  ;;  %v133_v25 = vpop.f32.mrb[2].mxu0  ;;  %v174_v26 = vpop.f32.mrb[2].mxu1 }
 0x107   :  { %v196_v27 = vadd.f32 %v195_v15, %v494_v10  ;;  %v223_v28 = vrot.slane %v219_v16, 4  ;;  %v208_v29 = vadd.f32 %v207_v17, %v496_v11  ;;  %v235_v30 = vrot.slane %v221_v18, 4  ;;  %v134_v31 = vpop.f32.mrb[3].mxu0  ;;  %v175_v32 = vpop.f32.mrb[3].mxu1 }
 0x108   :  { %v202_v33 = vadd.f32 %v201_v21, %v131_v19  ;;  %v229_v34 = vrot.slane %v220_v22, 4  ;;  %v214_v35 = vadd.f32 %v213_v23, %v172_v20  ;;  %v241_v36 = vrot.slane %v222_v24, 4 }
 0x109   :  { %v197_v37 = vrot.slane %v196_v27, 2  ;;  %v224_v38 = vadd.f32 %v223_v28, %v219_v16  ;;  %v209_v39 = vrot.slane %v208_v29, 2  ;;  %v236_v40 = vadd.f32 %v235_v30, %v221_v18 }
 0x10a   :  { %v203_v41 = vrot.slane %v202_v33, 2  ;;  %v230_v42 = vadd.f32 %v229_v34, %v220_v22  ;;  %v215_v43 = vrot.slane %v214_v35, 2  ;;  %v242_v44 = vadd.f32 %v241_v36, %v222_v24 }
 0x10b   :  { %v198_v45 = vadd.f32 %v197_v37, %v196_v27  ;;  %v225_v46 = vrot.slane %v224_v38, 2  ;;  %v210_v47 = vadd.f32 %v209_v39, %v208_v29  ;;  %v237_v48 = vrot.slane %v236_v40, 2 }
 0x10c   :  { %v204_v49 = vadd.f32 %v203_v41, %v202_v33  ;;  %v231_v50 = vrot.slane %v230_v42, 2  ;;  %v216_v51 = vadd.f32 %v215_v43, %v214_v35  ;;  %v243_v52 = vrot.slane %v242_v44, 2 }
 0x10d   :  { %v199_v53 = vrot.slane %v198_v45, 1  ;;  %v226_v54 = vadd.f32 %v225_v46, %v224_v38  ;;  %v211_v55 = vrot.slane %v210_v47, 1  ;;  %v238_v56 = vadd.f32 %v237_v48, %v236_v40 }
 0x10e   :  { %v205_v57 = vrot.slane %v204_v49, 1  ;;  %v232_v58 = vadd.f32 %v231_v50, %v230_v42  ;;  %v217_v59 = vrot.slane %v216_v51, 1  ;;  %v244_v60 = vadd.f32 %v243_v52, %v242_v44 }
 0x10f   :  { %v227_v61 = vrot.slane %v226_v54, 1  ;;  %v239_v62 = vrot.slane %v238_v56, 1  ;;  %v200_v1 = vadd.f32 %v199_v53, %v198_v45  ;;  %v212_v2 = vadd.f32 %v211_v55, %v210_v47 }
 0x110   :  { %v233_v3 = vrot.slane %v232_v58, 1  ;;  %v245_v4 = vrot.slane %v244_v60, 1  ;;  %v317_v7 = vpack.c.bf16 %v131_v19, %v494_v10  ;;  %v318_v8 = vpack.c.bf16 %v172_v20, %v496_v11 }
 0x111   :  { %v228_v5 = vadd.f32 %v227_v61, %v226_v54  ;;  %v240_v6 = vadd.f32 %v239_v62, %v238_v56  ;;  %v206_v9 = vadd.f32 %v205_v57, %v204_v49  ;;  %v218_v15 = vadd.f32 %v217_v59, %v216_v51 }
 0x112   :  { %v234_v12 = vadd.f32 %v233_v3, %v232_v58  ;;  %v246_v16 = vadd.f32 %v245_v4, %v244_v60  ;;  %193 = vst [vmem:[#allocation7] sm:$0xff] %v317_v7  ;;  %194 = vst [vmem:[#allocation7 + $0x8] sm:$0xff] %v318_v8  ;;  %v263_v17 = vsub.s32 %v260_v63, %v262_v0 }
 0x113   :  { %v248_v13 = vsel %vm247_vm1, %v200_v1, %v228_v5  ;;  %v250_v14 = vsel %vm247_vm1, %v212_v2, %v240_v6 }
 0x114   :  { %394 = shalt.err (!%p391_p6)
}
 0x115   :  { %s395_s14 = scalar_lea.hbm %s541_s2, 256 }
 0x116   :  { %p396_p7 = scmp.ne.s32.totalorder %s541_s2, %s395_s14  ;;  %p399_p8 = scmp.lt.u32.totalorder %s395_s14, %s541_s2 }
 0x118   :  { %p401_p9 = pnand %p399_p8, %p396_p7 }
 0x11a   :  { %404 = shalt.err (!%p401_p9)
}
 0x11b   :  { %284 = dma.vmem_to_hbm [thread:$0]  %s282_s10, 256, %s541_s2, [#allocation4]   ;;  %v249_v10 = vsel %vm247_vm1, %v206_v9, %v234_v12  ;;  %v251_v11 = vsel %vm247_vm1, %v218_v15, %v246_v16 }
 0x11c   :  { %v256_v18 = vcombine.low %v248_v13, %v249_v10  ;;  %v257_v19 = vcombine.low %v250_v14, %v251_v11  ;;  %s442_s21 = smov [#allocation8]  }
 0x11d   :  { %s291_s22 = sshll.u32 %s442_s21, 4  ;;  %s292_s22 = int_to_ptr.vmem [resolvable:$true] %s291_s22 }
 0x11e   :  { %v264_v20 = vrot.slane %v256_v18, %v263_v17  ;;  %v271_v21 = vrot.slane %v257_v19, %v263_v17  ;;  %s405_s23 = scalar_lea.vmem %s292_s22, 128  ;;  %p410_p11 = scmp.lt.s32.totalorder %s292_s22, %s292_s22 }
 0x11f   :  { %p406_p10 = scmp.ne.s32.totalorder %s292_s22, %s405_s23  ;;  %p411_p12 = scmp.lt.s32.totalorder %s405_s23, %s405_s23 }
 0x120   :  { %v272_v22 = vcombine.low %v264_v20, %v271_v21 }
 0x121   :  { %p412_p13 = por %p411_p12, %p410_p11 }
 0x122   :  { %274 = vst [vmem:[#allocation8] sm:$0xff] %v272_v22 }
 0x123   :  { %p413_p0 = pnand %p412_p13, %p406_p10 }
 0x125   :  { %416 = shalt.err (!%p413_p0)
}
 0x126   :  { %s417_s25 = scalar_lea.hbm %s542_s3, 128 }
 0x127   :  { %p418_p1 = scmp.ne.s32.totalorder %s542_s3, %s417_s25  ;;  %p421_p2 = scmp.lt.u32.totalorder %s417_s25, %s542_s3 }
 0x129   :  { %p423_p3 = pnand %p421_p2, %p418_p1 }
 0x12b   :  { %426 = shalt.err (!%p423_p3)
}
 0x12c   :  { %294 = dma.vmem_to_hbm [thread:$0]  %s292_s22, 128, %s542_s3, [#allocation9]  }
 0x12d   :  { %431 = dma.done.wait [#allocation4], 256  }
 0x12e   :  { %432 = vsyncadd [#allocation4], 4294967040 }
 0x12f   :  { %433 = dma.done.wait [#allocation9], 128  }
 0x130   :  { %434 = vsyncadd [#allocation9], 4294967168 }
 0x131   :  { %301 = vsyncpa [#allocation3], 1 }
 0x132   :  { %302 = vsyncpa [#allocation6], 1 }
 0x133   :  { %303 = vsyncpa [#allocation4], 1 }
 0x134   :  { %304 = vsyncpa [#allocation9], 1 }

</bundles_post_ra>
